<compile_context>
chip_gen: v5e
topology: v5e:2x2
jax: 0.10.0
libtpu: 0.0.40
codegen_flags: <defaults>
</compile_context>

<pallas_src>
import math

import jax
import jax.numpy as jnp
from jax.experimental import pallas as pl
from jax.experimental.pallas import tpu as pltpu


def _sublane_multiple(dtype) -> int:
    """Rows per packed vreg for this dtype: 8 (f32), 16 (bf16), 32 (int8/fp8)."""
    itemsize = jnp.dtype(dtype).itemsize
    if itemsize >= 4:
        return 8
    return (4 // itemsize) * 8


def _choose_slab(total, sub):
    """Lane-dense (rows, lanes) factorization of `total`.

    Prefers large lanes (multiple of 128) with rows % sub == 0 so every DMA
    chunk covers whole (sub, 128) layout tiles.  Returns None if `total` is
    not a multiple of 128.
    """
    cands = [l for l in (8192, 4096, 2048, 1024, 512, 256, 128) if total % l == 0]
    if not cands:
        return None
    for lanes in cands:
        rows = total // lanes
        if rows % sub == 0:
            return rows, lanes
    lanes = cands[0]
    return total // lanes, lanes


def _plan_chunks(rows, row_bytes, sub, max_chunks=8, min_chunk_bytes=1 << 20):
    """Split `rows` into up to `max_chunks` DMA chunks of >= ~1 MiB each."""
    total_bytes = rows * row_bytes
    n = int(min(max_chunks, max(1, total_bytes // min_chunk_bytes), max(1, rows)))
    chunk_rows = -(-rows // n)  # ceil div
    # Align chunk starts to the dtype's sublane packing when possible.
    if chunk_rows % sub and rows > sub:
        chunk_rows = -(-chunk_rows // sub) * sub
    n = -(-rows // chunk_rows)
    return n, chunk_rows


def _make_dma_copy_kernel(rows, n_chunks, chunk_rows):
    """Kernel: chunked HBM->HBM DMA copy of a (rows, lanes) slab."""

    def kernel(x_hbm, o_hbm, sems):
        copies = []
        for k in range(n_chunks):                 # static Python unroll
            start = k * chunk_rows
            size = min(chunk_rows, rows - start)  # last chunk may be short
            copies.append(
                pltpu.make_async_copy(
                    x_hbm.at[pl.ds(start, size)],
                    o_hbm.at[pl.ds(start, size)],
                    sems.at[k],
                )
            )
        # Start all chunks first (multiple DMAs in flight), then wait.
        for cp in copies:
            cp.start()
        for cp in copies:
            cp.wait()

    return kernel


def reshape_pallas(x, target_shape):
    """Equivalent of Reshape(*target_shape)(x) == x.view((x.size(0),) + target_shape)."""
    b = x.shape[0]
    target_shape = tuple(int(d) for d in target_shape)
    total = math.prod(x.shape)
    per_batch = (total // b) if b else 0

    # Validate like torch .view (element count per batch row must match).
    assert math.prod(target_shape) == per_batch, (
        f"cannot view {x.shape} as (B,)+{target_shape}")
    out_shape = (b,) + target_shape

    if total == 0:
        return jnp.reshape(x, out_shape)

    dtype = x.dtype
    itemsize = jnp.dtype(dtype).itemsize
    sub = _sublane_multiple(dtype)

    slab = _choose_slab(total, sub)
    if slab is None:
        # Not a multiple of 128: any row-major factorization works, since the
        # HBM->HBM DMA path has no VMEM block-shape constraints.
        rows, lanes = b, per_batch
    else:
        rows, lanes = slab

    n_chunks, chunk_rows = _plan_chunks(rows, lanes * itemsize, sub)

    flat = x.reshape(rows, lanes)  # row-major flatten == torch contiguous view

    out_flat = pl.pallas_call(
        _make_dma_copy_kernel(rows, n_chunks, chunk_rows),
        out_shape=jax.ShapeDtypeStruct((rows, lanes), dtype),
        in_specs=[pl.BlockSpec(memory_space=pl.ANY)],
        out_specs=pl.BlockSpec(memory_space=pl.ANY),
        scratch_shapes=[pltpu.SemaphoreType.DMA((n_chunks,))],
        cost_estimate=pl.CostEstimate(
            flops=0,
            transcendentals=0,
            bytes_accessed=2 * total * itemsize,
        ),
    )(flat)

    return out_flat.reshape(out_shape)


if __name__ == "__main__":
    key = jax.random.PRNGKey(0)
    # Small NCHW input consistent with how Reshape is used inside the decoder.
    B, C, H, W = 2, 4, 16, 16
    x = jax.random.normal(key, (B, C, H, W), dtype=jnp.float32)

    # Reshape(4, 256): (B, 4, 16, 16) -> (B, 4, 256)
    target_shape = (4, 256)

    fn = jax.jit(lambda t: reshape_pallas(t, target_shape))
    out = jax.block_until_ready(fn(x))

    # Reference: torch x.view((B,) + shape) on contiguous input == row-major reshape.
    ref = x.reshape((B,) + target_shape)
    assert out.shape == (B,) + target_shape, out.shape
    assert out.dtype == x.dtype
    assert jnp.array_equal(out, ref), "mismatch vs reference reshape"

    print("KERNEL_OK")
</pallas_src>

<mosaic_0001>
module attributes {stable_mosaic.version = 11 : i64} {
  func.func @kernel(%arg0: memref<8x256xf32, #tpu.memory_space<any>>, %arg1: memref<8x256xf32, #tpu.memory_space<any>>, %arg2: memref<1x!tpu.dma_semaphore, #tpu.memory_space<semaphore_mem>>) attributes {dimension_semantics = [], scalar_prefetch = 0 : i64, scratch_operands = 1 : i64, tpu.core_type = #tpu.core_type<tc>} {
    %c0_i32 = arith.constant 0 : i32
    %c0_i32_0 = arith.constant 0 : i32
    %c0_i32_1 = arith.constant 0 : i32
    %0 = tpu.memref_slice %arg0[%c0_i32_0, %c0_i32_1] : memref<8x256xf32, #tpu.memory_space<any>> -> memref<8x256xf32, #tpu.memory_space<any>>
    %c0_i32_2 = arith.constant 0 : i32
    %c0_i32_3 = arith.constant 0 : i32
    %1 = tpu.memref_slice %arg1[%c0_i32_2, %c0_i32_3] : memref<8x256xf32, #tpu.memory_space<any>> -> memref<8x256xf32, #tpu.memory_space<any>>
    %2 = tpu.memref_slice %arg2[%c0_i32] : memref<1x!tpu.dma_semaphore, #tpu.memory_space<semaphore_mem>> -> memref<1x!tpu.dma_semaphore, #tpu.memory_space<semaphore_mem>>
    %3 = tpu.memref_squeeze %2 : memref<1x!tpu.dma_semaphore, #tpu.memory_space<semaphore_mem>> -> memref<!tpu.dma_semaphore, #tpu.memory_space<semaphore_mem>>
    tpu.enqueue_dma source(%0 : memref<8x256xf32, #tpu.memory_space<any>>) target(%1 : memref<8x256xf32, #tpu.memory_space<any>>) target_semaphore(%3 : memref<!tpu.dma_semaphore, #tpu.memory_space<semaphore_mem>>)
    %c0_i32_4 = arith.constant 0 : i32
    %c0_i32_5 = arith.constant 0 : i32
    %c0_i32_6 = arith.constant 0 : i32
    %4 = tpu.memref_slice %arg0[%c0_i32_5, %c0_i32_6] : memref<8x256xf32, #tpu.memory_space<any>> -> memref<8x256xf32, #tpu.memory_space<any>>
    %c0_i32_7 = arith.constant 0 : i32
    %c0_i32_8 = arith.constant 0 : i32
    %5 = tpu.memref_slice %arg1[%c0_i32_7, %c0_i32_8] : memref<8x256xf32, #tpu.memory_space<any>> -> memref<8x256xf32, #tpu.memory_space<any>>
    %6 = tpu.memref_slice %arg2[%c0_i32_4] : memref<1x!tpu.dma_semaphore, #tpu.memory_space<semaphore_mem>> -> memref<1x!tpu.dma_semaphore, #tpu.memory_space<semaphore_mem>>
    %7 = tpu.memref_squeeze %6 : memref<1x!tpu.dma_semaphore, #tpu.memory_space<semaphore_mem>> -> memref<!tpu.dma_semaphore, #tpu.memory_space<semaphore_mem>>
    tpu.wait_dma2 semaphore(%7 : memref<!tpu.dma_semaphore, #tpu.memory_space<semaphore_mem>>) src(%4 : memref<8x256xf32, #tpu.memory_space<any>>) dst(%5 : memref<8x256xf32, #tpu.memory_space<any>>)
    return
  }
}

</mosaic_0001>

<bundles_post_ra>
// kernel: _lambda_.1
= control target key start
LH: loop header
LB: loop body
LE: loop exit
PB: predicated region body
PF: predicated region fallthrough
CT: control target
= control target key end

     0   :  { %s65_s0 = inlined_call_operand.vmem [shape: f32[8,256], index: 0, kind: input, shape index: {}]   ;;  %s66_s1 = inlined_call_operand.vmem [shape: f32[8,256], index: 1, kind: output, shape index: {}]  }
   0x1   :  { %v16_v0 = vld [vmem:[%s65_s0] sm:$0xff]  ;;  %v18_v1 = vld [vmem:[%s65_s0 + $0x8] sm:$0xff] }
   0x2   :  { %17 = vst [vmem:[%s66_s1] sm:$0xff] %v16_v0 }
   0x3   :  { %19 = vst [vmem:[%s66_s1 + $0x8] sm:$0xff] %v18_v1 }
   0x4   :  { %25 = vsyncadd [#allocation2], 256 }
   0x5   :  { %41 = dma.done.wait [#allocation2], 256 }
   0x6   :  { %42 = vsyncadd [#allocation2], 4294967040 }
   0x7   :  { %30 = vsyncmov [#allocation2] }
   0xa   :  { %s31_s14 = vpop.sfrf %30 }
   0xb   :  { %p40_p0 = scmp.ne.s32.totalorder %s31_s14, 0 }
   0xd   :  { %35 = shalt.err (%p40_p0)  }

</bundles_post_ra>
